<compile_context>
chip_gen: v7x
topology: tpu7x:2x2x1
jax: 0.10.0
libtpu: 0.0.40
codegen_flags: <defaults>
</compile_context>

<pallas_src>
import jax
import jax.numpy as jnp
from jax.experimental import pallas as pl
from jax.experimental.pallas import tpu as pltpu


def _round_up(x, m):
    return ((x + m - 1) // m) * m


def _cdiv(a, b):
    return (a + b - 1) // b


def _pick_pack_factor():
    # Lane-packing factor by TPU generation (see header comment).
    try:
        kind = jax.devices()[0].device_kind.lower()
    except Exception:
        return 16
    if "v5" in kind:
        return 8
    if "v6" in kind:
        return 32
    if "v7" in kind:
        return 16
    return 16


def _phrase_filters_kernel(x_ref, w_ref, b_ref, o_ref):
    # x_ref : (TMp, P*dim_in)        VMEM  (streamed packed row tile)
    # w_ref : (P*dim_in, P*dim_out)  VMEM  (resident block-diagonal weight)
    # b_ref : (1, P*dim_out)         VMEM  (resident; phrase_bias pre-folded)
    # o_ref : (TMp, P*dim_out)       VMEM
    y = jnp.dot(x_ref[...], w_ref[...], preferred_element_type=jnp.float32)
    o_ref[...] = (y + b_ref[...]).astype(o_ref.dtype)


def phrase_neural_filters_forward(inputs, weight, bias, phrase_bias,
                                  hidden=None, seq_lengths=None,
                                  max_length=None, *, force_pallas=False):
    """Mirrors PhraseNeuralFilters.forward -> (output_flat, None).

    inputs:      (T, B, dim_in) float32   (sequence-major, PyTorch-RNN style)
    weight:      (dim_in, dim_out) float32 (synthetic flat model)
    bias:        (dim_out,) float32
    phrase_bias: scalar (or shape-(1,)) float32 registered Parameter
    """
    T, B, dim_in = inputs.shape
    dim_out = weight.shape[1]
    M = T * B

    # Fold phrase_bias into channel 0 of the bias (matches output[...,0] += pb).
    pb = jnp.reshape(jnp.asarray(phrase_bias, bias.dtype), ())
    fused_bias = bias.at[0].add(pb)

    # Small-M fast path: let XLA fuse the tiny GEMM + bias (no kernel overhead).
    if M < 4096 and not force_pallas:
        out = jnp.einsum("tbi,io->tbo", inputs, weight) + fused_bias
        return out, None

    P = _pick_pack_factor()
    dim_in_p = P * dim_in
    dim_out_p = P * dim_out

    # Packed-row tile: ~2 MiB of activations per buffer, multiple of 8
    # sublanes, capped so the grid keeps ~8 steps when data allows (v7x TCs).
    M_packed = _cdiv(M, P)
    tile_target = max(8, ((2 * 1024 * 1024) // (dim_in_p * 4)) // 8 * 8)
    tile_split = _round_up(_cdiv(M_packed, 8), 8)
    TMp = max(8, min(tile_target, tile_split))
    n_tiles = _cdiv(M_packed, TMp)
    Mp_pad = n_tiles * TMp
    M_pad = Mp_pad * P

    x2d = inputs.reshape(M, dim_in)
    if M_pad != M:
        x2d = jnp.pad(x2d, ((0, M_pad - M), (0, 0)))
    x_packed = x2d.reshape(Mp_pad, dim_in_p)          # free contiguous view

    # Block-diagonal weight: P copies of (dim_in, dim_out) on the diagonal so
    # packed_x @ w_big applies W independently to each of the P sub-rows.
    eye_p = jnp.eye(P, dtype=weight.dtype)
    w_big = jnp.einsum("pq,io->piqo", eye_p, weight).reshape(dim_in_p, dim_out_p)
    b_big = jnp.tile(fused_bias, P).reshape(1, dim_out_p)

    x_tile_bytes = TMp * dim_in_p * 4
    o_tile_bytes = TMp * dim_out_p * 4
    vmem_limit = int(4 * (x_tile_bytes + o_tile_bytes)
                     + dim_in_p * dim_out_p * 4 + dim_out_p * 4
                     + (4 << 20))

    cost = pl.CostEstimate(
        flops=2 * Mp_pad * dim_in_p * dim_out_p,
        transcendentals=0,
        bytes_accessed=4 * (Mp_pad * dim_in_p + dim_in_p * dim_out_p
                            + dim_out_p + Mp_pad * dim_out_p),
    )

    out_packed = pl.pallas_call(
        _phrase_filters_kernel,
        out_shape=jax.ShapeDtypeStruct((Mp_pad, dim_out_p), jnp.float32),
        grid=(n_tiles,),
        in_specs=[
            pl.BlockSpec((TMp, dim_in_p), lambda i: (i, 0)),        # streamed x
            pl.BlockSpec((dim_in_p, dim_out_p), lambda i: (0, 0)),  # resident W
            pl.BlockSpec((1, dim_out_p), lambda i: (0, 0)),         # resident b
        ],
        out_specs=pl.BlockSpec((TMp, dim_out_p), lambda i: (i, 0)),
        compiler_params=pltpu.CompilerParams(
            dimension_semantics=("parallel",),
            vmem_limit_bytes=vmem_limit),
        cost_estimate=cost,
    )(x_packed, w_big, b_big)

    output_flat = out_packed.reshape(M_pad, dim_out)[:M].reshape(T, B, dim_out)
    return output_flat, None


def _reference(inputs, weight, bias, phrase_bias):
    y = jnp.einsum("tbi,io->tbo", inputs, weight) + bias
    return y.at[..., 0].add(jnp.reshape(jnp.asarray(phrase_bias), ()))


if __name__ == "__main__":
    # Small deterministic shapes consistent with the module's forward:
    # sequence length T=8, batch B=2, dim_in=32, dim_out=4.
    T, B, dim_in, dim_out = 8, 2, 32, 4
    phrase_bias_init = 4.5  # hparams.phrase_bias_init (synthetic)

    key = jax.random.PRNGKey(0)
    k_x, k_w, k_b = jax.random.split(key, 3)
    inputs = jax.random.normal(k_x, (T, B, dim_in), jnp.float32)
    weight = jax.random.normal(k_w, (dim_in, dim_out), jnp.float32) * 0.1
    bias = jax.random.normal(k_b, (dim_out,), jnp.float32) * 0.01
    phrase_bias = jnp.float32(phrase_bias_init)

    out, hidden = phrase_neural_filters_forward(
        inputs, weight, bias, phrase_bias, force_pallas=True)
    out = jax.block_until_ready(out)

    ref = _reference(inputs, weight, bias, phrase_bias)
    assert out.shape == (T, B, dim_out)
    assert hidden is None
    assert jnp.allclose(out, ref, atol=1e-5, rtol=1e-5), "mismatch vs reference"

    # Second check: ragged M (not a multiple of pack/tile) + multi-step grid.
    T2, B2 = 250, 3
    inputs2 = jax.random.normal(jax.random.PRNGKey(1), (T2, B2, dim_in),
                                jnp.float32)
    out2, _ = phrase_neural_filters_forward(
        inputs2, weight, bias, phrase_bias, force_pallas=True)
    out2 = jax.block_until_ready(out2)
    ref2 = _reference(inputs2, weight, bias, phrase_bias)
    assert out2.shape == (T2, B2, dim_out)
    assert jnp.allclose(out2, ref2, atol=1e-5, rtol=1e-5), "mismatch (ragged)"

    print("KERNEL_OK")
</pallas_src>

<mosaic_0001>
module attributes {stable_mosaic.version = 11 : i64} {
  func.func @_phrase_filters_kernel(%arg0: i32, %arg1: memref<8x512xf32, #tpu.memory_space<vmem>>, %arg2: memref<512x64xf32, #tpu.memory_space<vmem>>, %arg3: memref<1x64xf32, #tpu.memory_space<vmem>>, %arg4: memref<8x64xf32, #tpu.memory_space<vmem>>) attributes {dimension_semantics = [#tpu.dimension_semantics<parallel>], iteration_bounds = array<i64: 1>, scalar_prefetch = 0 : i64, scratch_operands = 0 : i64, tpu.core_type = #tpu.core_type<tc>, window_params = [{transform_indices = @transform_0, window_bounds = array<i64: 8, 512>}, {pipeline_mode = #tpu.pipeline_mode<synchronous>, transform_indices = @transform_1, window_bounds = array<i64: 512, 64>}, {pipeline_mode = #tpu.pipeline_mode<synchronous>, transform_indices = @transform_2, window_bounds = array<i64: 1, 64>}, {transform_indices = @transform_3, window_bounds = array<i64: 8, 64>}]} {
    %c0 = arith.constant 0 : index
    %c0_0 = arith.constant 0 : index
    %0 = vector.load %arg1[%c0, %c0_0] : memref<8x512xf32, #tpu.memory_space<vmem>>, vector<8x512xf32>
    %c0_1 = arith.constant 0 : index
    %c0_2 = arith.constant 0 : index
    %1 = vector.load %arg2[%c0_1, %c0_2] : memref<512x64xf32, #tpu.memory_space<vmem>>, vector<512x64xf32>
    %cst = arith.constant dense<0.000000e+00> : vector<8x64xf32>
    %2 = tpu.matmul %0, %1, %cst {dimension_numbers = #tpu.dot_dimension_numbers<[1], [0], [0], [1], [0, 0, 1, 1], [], []>} : vector<8x512xf32>, vector<512x64xf32>, vector<8x64xf32> -> vector<8x64xf32>
    %c0_3 = arith.constant 0 : index
    %c0_4 = arith.constant 0 : index
    %3 = vector.load %arg3[%c0_3, %c0_4] : memref<1x64xf32, #tpu.memory_space<vmem>>, vector<1x64xf32>
    %4 = vector.broadcast %3 : vector<1x64xf32> to vector<8x64xf32>
    %5 = arith.addf %2, %4 : vector<8x64xf32>
    %c0_5 = arith.constant 0 : index
    %c0_6 = arith.constant 0 : index
    %6 = vector.load %arg4[%c0_5, %c0_6] : memref<8x64xf32, #tpu.memory_space<vmem>>, vector<8x64xf32>
    tpu.vector_store %arg4[%c0_5, %c0_6], %5 {strides = array<i32>} : memref<8x64xf32, #tpu.memory_space<vmem>>, vector<8x64xf32>,
    return
  }
  func.func @transform_0(%arg0: i32) -> (i32, i32) {
    %c0_i32 = arith.constant 0 : i32
    %c0_i32_0 = arith.constant 0 : i32
    return %arg0, %c0_i32 : i32, i32
  }
  func.func @transform_1(%arg0: i32) -> (i32, i32) {
    %c0_i32 = arith.constant 0 : i32
    %c0_i32_0 = arith.constant 0 : i32
    %c0_i32_1 = arith.constant 0 : i32
    return %c0_i32, %c0_i32_0 : i32, i32
  }
  func.func @transform_2(%arg0: i32) -> (i32, i32) {
    %c0_i32 = arith.constant 0 : i32
    %c0_i32_0 = arith.constant 0 : i32
    %c0_i32_1 = arith.constant 0 : i32
    return %c0_i32, %c0_i32_0 : i32, i32
  }
  func.func @transform_3(%arg0: i32) -> (i32, i32) {
    %c0_i32 = arith.constant 0 : i32
    %c0_i32_0 = arith.constant 0 : i32
    return %arg0, %c0_i32 : i32, i32
  }
}

</mosaic_0001>

<bundles_post_ra>
// kernel: tpu_custom_call.1
= control target key start
LH: loop header
LB: loop body
LE: loop exit
PB: predicated region body
PF: predicated region fallthrough
CT: control target
= control target key end

     0   :  { %s646_s0 = inlined_call_operand.vmem [shape: f32[8,512], index: 0, kind: input, shape index: {}]   ;;  %s647_s1 = inlined_call_operand.vmem [shape: f32[512,64], index: 1, kind: input, shape index: {}]   ;;  %s648_s2 = inlined_call_operand.vmem [shape: f32[1,64], index: 2, kind: input, shape index: {}]   ;;  %s649_s3 = inlined_call_operand.hbm [shape: f32[8,64], index: 3, kind: output, shape index: {}]  }
   0x1   :  { %v35_v0 = vld [vmem:[%s647_s1 + $0x80] sm:$0xff]  ;;  %v36_v1 = vld [vmem:[%s647_s1 + $0x88] sm:$0xff]  ;;  %v37_v11 = vld [vmem:[%s647_s1 + $0x90] sm:$0xff] }
   0x2   :  { %v19_v2 = vld [vmem:[%s647_s1] sm:$0xff]  ;;  %v317_v3 = vpack.c.bf16 %v36_v1, %v35_v0  ;;  %v20_v4 = vld [vmem:[%s647_s1 + $0x8] sm:$0xff]  ;;  %v38_v13 = vld [vmem:[%s647_s1 + $0x98] sm:$0xff] }
   0x3   :  { %v67_v5 = vld [vmem:[%s647_s1 + $0x180] sm:$0xff]  ;;  %v68_v6 = vld [vmem:[%s647_s1 + $0x188] sm:$0xff]  ;;  %v319_v7 = vpack.c.bf16 %v20_v4, %v19_v2  ;;  %v21_v14 = vld [vmem:[%s647_s1 + $0x10] sm:$0xff]  ;;  %v321_v16 = vpack.c.bf16 %v38_v13, %v37_v11 }
   0x4   :  { %v349_v8 = vpack.c.bf16 %v68_v6, %v67_v5  ;;  %v51_v9 = vld [vmem:[%s647_s1 + $0x100] sm:$0xff]  ;;  %v52_v10 = vld [vmem:[%s647_s1 + $0x108] sm:$0xff]  ;;  %318 = vmatprep.subr.bf16.mxu0 %v317_v3  ;;  %v22_v15 = vld [vmem:[%s647_s1 + $0x18] sm:$0xff] }
   0x5   :  { %v351_v12 = vpack.c.bf16 %v52_v10, %v51_v9  ;;  %320 = vmatpush3.bf16.msra.mxu0 %v319_v7  ;;  %v323_v17 = vpack.c.bf16 %v22_v15, %v21_v14  ;;  %v69_v18 = vld [vmem:[%s647_s1 + $0x190] sm:$0xff]  ;;  %v70_v19 = vld [vmem:[%s647_s1 + $0x198] sm:$0xff]  ;;  %v39_v23 = vld [vmem:[%s647_s1 + $0xa0] sm:$0xff] }
   0x6   :  { %350 = vmatprep.subr.bf16.mxu1 %v349_v8  ;;  %v53_v20 = vld [vmem:[%s647_s1 + $0x110] sm:$0xff]  ;;  %v353_v21 = vpack.c.bf16 %v70_v19, %v69_v18  ;;  %v54_v22 = vld [vmem:[%s647_s1 + $0x118] sm:$0xff]  ;;  %v40_v24 = vld [vmem:[%s647_s1 + $0xa8] sm:$0xff]  ;;  %322 = vmatprep.subr.bf16.mxu0 %v321_v16 }
   0x7   :  { %352 = vmatpush3.bf16.msra.mxu1 %v351_v12  ;;  %v355_v25 = vpack.c.bf16 %v54_v22, %v53_v20  ;;  %v325_v26 = vpack.c.bf16 %v40_v24, %v39_v23  ;;  %v23_v27 = vld [vmem:[%s647_s1 + $0x20] sm:$0xff]  ;;  %v24_v28 = vld [vmem:[%s647_s1 + $0x28] sm:$0xff]  ;;  %v41_v35 = vld [vmem:[%s647_s1 + $0xb0] sm:$0xff] }
   0x8   :  { %v71_v29 = vld [vmem:[%s647_s1 + $0x1a0] sm:$0xff]  ;;  %354 = vmatprep.subr.bf16.mxu1 %v353_v21  ;;  %v72_v30 = vld [vmem:[%s647_s1 + $0x1a8] sm:$0xff]  ;;  %v327_v33 = vpack.c.bf16 %v24_v28, %v23_v27  ;;  %v42_v36 = vld [vmem:[%s647_s1 + $0xb8] sm:$0xff] }
   0x9   :  { %v55_v31 = vld [vmem:[%s647_s1 + $0x120] sm:$0xff]  ;;  %v56_v32 = vld [vmem:[%s647_s1 + $0x128] sm:$0xff]  ;;  %324 = vmatpush3.bf16.msra.mxu0 %v323_v17  ;;  %v357_v34 = vpack.c.bf16 %v72_v30, %v71_v29  ;;  %v25_v37 = vld [vmem:[%s647_s1 + $0x30] sm:$0xff]  ;;  %v329_v39 = vpack.c.bf16 %v42_v36, %v41_v35 }
   0xa   :  { %326 = vmatprep.subr.bf16.mxu0 %v325_v26  ;;  %v359_v38 = vpack.c.bf16 %v56_v32, %v55_v31  ;;  %v26_v40 = vld [vmem:[%s647_s1 + $0x38] sm:$0xff]  ;;  %v73_v41 = vld [vmem:[%s647_s1 + $0x1b0] sm:$0xff]  ;;  %v43_v46 = vld [vmem:[%s647_s1 + $0xc0] sm:$0xff] }
   0xb   :  { %356 = vmatpush3.bf16.msra.mxu1 %v355_v25  ;;  %v74_v42 = vld [vmem:[%s647_s1 + $0x1b8] sm:$0xff]  ;;  %v57_v44 = vld [vmem:[%s647_s1 + $0x130] sm:$0xff]  ;;  %v44_v47 = vld [vmem:[%s647_s1 + $0xc8] sm:$0xff]  ;;  %v331_v48 = vpack.c.bf16 %v26_v40, %v25_v37 }
   0xc   :  { %358 = vmatprep.subr.bf16.mxu1 %v357_v34  ;;  %v361_v43 = vpack.c.bf16 %v74_v42, %v73_v41  ;;  %v58_v45 = vld [vmem:[%s647_s1 + $0x138] sm:$0xff]  ;;  %v75_v49 = vld [vmem:[%s647_s1 + $0x1c0] sm:$0xff]  ;;  %v76_v50 = vld [vmem:[%s647_s1 + $0x1c8] sm:$0xff]  ;;  %v333_v52 = vpack.c.bf16 %v44_v47, %v43_v46 }
   0xd   :  { %328 = vmatpush3.bf16.msra.mxu0 %v327_v33  ;;  %v363_v51 = vpack.c.bf16 %v58_v45, %v57_v44  ;;  %v27_v53 = vld [vmem:[%s647_s1 + $0x40] sm:$0xff]  ;;  %v28_v54 = vld [vmem:[%s647_s1 + $0x48] sm:$0xff]  ;;  %v365_v56 = vpack.c.bf16 %v76_v50, %v75_v49  ;;  %v45_v58 = vld [vmem:[%s647_s1 + $0xd0] sm:$0xff] }
   0xe   :  { %330 = vmatprep.subr.bf16.mxu0 %v329_v39  ;;  %v59_v55 = vld [vmem:[%s647_s1 + $0x140] sm:$0xff]  ;;  %v60_v57 = vld [vmem:[%s647_s1 + $0x148] sm:$0xff]  ;;  %v46_v59 = vld [vmem:[%s647_s1 + $0xd8] sm:$0xff]  ;;  %v335_v62 = vpack.c.bf16 %v28_v54, %v27_v53 }
   0xf   :  { %360 = vmatpush3.bf16.msra.mxu1 %v359_v38  ;;  %v77_v60 = vld [vmem:[%s647_s1 + $0x1d0] sm:$0xff]  ;;  %v78_v61 = vld [vmem:[%s647_s1 + $0x1d8] sm:$0xff]  ;;  %v367_v63 = vpack.c.bf16 %v60_v57, %v59_v55  ;;  %v337_v0 = vpack.c.bf16 %v46_v59, %v45_v58  ;;  %v47_v6 = vld [vmem:[%s647_s1 + $0xe0] sm:$0xff] }
  0x10   :  { %362 = vmatprep.subr.bf16.mxu1 %v361_v43  ;;  %v29_v1 = vld [vmem:[%s647_s1 + $0x50] sm:$0xff]  ;;  %v30_v2 = vld [vmem:[%s647_s1 + $0x58] sm:$0xff]  ;;  %v369_v4 = vpack.c.bf16 %v78_v61, %v77_v60  ;;  %v48_v7 = vld [vmem:[%s647_s1 + $0xe8] sm:$0xff] }
  0x11   :  { %332 = vmatpush3.bf16.msra.mxu0 %v331_v48  ;;  %v61_v3 = vld [vmem:[%s647_s1 + $0x150] sm:$0xff]  ;;  %v62_v5 = vld [vmem:[%s647_s1 + $0x158] sm:$0xff]  ;;  %v79_v8 = vld [vmem:[%s647_s1 + $0x1e0] sm:$0xff]  ;;  %v339_v10 = vpack.c.bf16 %v30_v2, %v29_v1  ;;  %v341_v15 = vpack.c.bf16 %v48_v7, %v47_v6 }
  0x12   :  { %334 = vmatprep.subr.bf16.mxu0 %v333_v52  ;;  %v80_v9 = vld [vmem:[%s647_s1 + $0x1e8] sm:$0xff]  ;;  %v31_v11 = vld [vmem:[%s647_s1 + $0x60] sm:$0xff]  ;;  %v371_v14 = vpack.c.bf16 %v62_v5, %v61_v3  ;;  %v49_v17 = vld [vmem:[%s647_s1 + $0xf0] sm:$0xff] }
  0x13   :  { %364 = vmatpush3.bf16.msra.mxu1 %v363_v51  ;;  %v32_v12 = vld [vmem:[%s647_s1 + $0x68] sm:$0xff]  ;;  %v63_v13 = vld [vmem:[%s647_s1 + $0x160] sm:$0xff]  ;;  %v373_v19 = vpack.c.bf16 %v80_v9, %v79_v8  ;;  %v50_v20 = vld [vmem:[%s647_s1 + $0xf8] sm:$0xff] }
  0x14   :  { %366 = vmatprep.subr.bf16.mxu1 %v365_v56  ;;  %v64_v16 = vld [vmem:[%s647_s1 + $0x168] sm:$0xff]  ;;  %v18_v21 = vld [vmem:[%s646_s0 + $0x18] sm:$0xff] }
  0x15   :  { %336 = vmatpush3.bf16.msra.mxu0 %v335_v62  ;;  %v16_v18 = vld [vmem:[%s646_s0 + $0x8] sm:$0xff] }
  0x16   :  { %338 = vmatprep.subr.bf16.mxu0 %v337_v0  ;;  %154 = vmatprep.mubr.f32.mxu0 %v16_v18 }
  0x17   :  { %368 = vmatpush3.bf16.msra.mxu1 %v367_v63 }
  0x18   :  { %370 = vmatprep.subr.bf16.mxu1 %v369_v4 }
  0x19   :  { %8 = vsyncpa [#allocation3], 0  ;;  %v81_v22 = vld [vmem:[%s647_s1 + $0x1f0] sm:$0xff]  ;;  %v82_v23 = vld [vmem:[%s647_s1 + $0x1f8] sm:$0xff]  ;;  %224 = vmatprep.mubr.f32.mxu1 %v18_v21  ;;  %340 = vmatpush3.bf16.msra.mxu0 %v339_v10  ;;  %v343_v24 = vpack.c.bf16 %v32_v12, %v31_v11  ;;  %v375_v25 = vpack.c.bf16 %v64_v16, %v63_v13  ;;  %v345_v26 = vpack.c.bf16 %v50_v20, %v49_v17  ;;  %s406_s14 = smov [#allocation2]   ;;  %vm230_vm0 = vcmask 523264  }
  0x1a   :  { %342 = vmatprep.subr.bf16.mxu0 %v341_v15  ;;  %v33_v27 = vld [vmem:[%s647_s1 + $0x70] sm:$0xff]  ;;  %v34_v28 = vld [vmem:[%s647_s1 + $0x78] sm:$0xff]  ;;  %v377_v29 = vpack.c.bf16 %v82_v23, %v81_v22  ;;  %v15_v34 = vld [vmem:[%s646_s0] sm:$0xff]  ;;  %s238_s15 = sshll.u32 %s406_s14, 4  ;;  %s239_s15 = int_to_ptr.vmem [resolvable:$true] %s238_s15 }
  0x1b   :  { %372 = vmatpush3.bf16.msra.mxu1 %v371_v14  ;;  %v65_v30 = vld [vmem:[%s647_s1 + $0x170] sm:$0xff]  ;;  %v66_v31 = vld [vmem:[%s647_s1 + $0x178] sm:$0xff]  ;;  %v347_v32 = vpack.c.bf16 %v34_v28, %v33_v27  ;;  %v246_v37 = vld [vmem:[%s648_s2] ss:$0 sm:$0xff]  ;;  %p387_p1 = scmp.lt.s32.totalorder %s239_s15, %s239_s15 }
  0x1c   :  { %374 = vmatprep.subr.bf16.mxu1 %v373_v19  ;;  %v379_v33 = vpack.c.bf16 %v66_v31, %v65_v30  ;;  %v17_v35 = vld [vmem:[%s646_s0 + $0x10] sm:$0xff]  ;;  %s382_s0 = scalar_lea.vmem %s239_s15, 128 }
  0x1d   :  { %344 = vmatpush3.bf16.msra.mxu0 %v343_v24  ;;  %p383_p0 = scmp.ne.s32.totalorder %s239_s15, %s382_s0  ;;  %p388_p2 = scmp.lt.s32.totalorder %s382_s0, %s382_s0 }
  0x1e   :  { %346 = vmatprep.subr.bf16.mxu0 %v345_v26 }
  0x1f   :  { %376 = vmatpush3.bf16.msra.mxu1 %v375_v25  ;;  %p389_p3 = por %p388_p2, %p387_p1 }
  0x20   :  { %378 = vmatprep.subr.bf16.mxu1 %v377_v29 }
  0x21   :  { %348 = vmatpush3.bf16.msra.mxu0 %v347_v32  ;;  %p390_p4 = pnand %p389_p3, %p383_p0 }
  0x23   :  { %380 = vmatpush3.bf16.msra.mxu1 %v379_v33 }
  0x24   :  { %155 = vmatmul.mubr.f32.vlgmr.msra.gmra.mrb[0].mxu0 %v15_v34 }
  0x26   :  { %225 = vmatmul.mubr.f32.vlgmr.msra.gmra.mrb[0].mxu1 %v17_v35 }
  0xf7   :  { %v279_v36 = vpop.f32.mrb[0].mxu0 }
  0xf8   :  { %v280_v38 = vpop.f32.mrb[1].mxu0 }
  0xf9   :  { %v314_v39 = vpop.f32.mrb[0].mxu1  ;;  %v281_v40 = vadd.f32 %v280_v38, %v279_v36 }
  0xfa   :  { %v315_v41 = vpop.f32.mrb[1].mxu1 }
  0xfb   :  { %v316_v42 = vadd.f32 %v315_v41, %v314_v39  ;;  %v157_v43 = vadd.f32 %v281_v40, %v246_v37 }
  0xfd   :  { %v227_v44 = vadd.f32 %v316_v42, %v157_v43 }
  0xff   :  { %231 = vst.msk [vmem:[#allocation2] sm:$0xff] %vm230_vm0, %v227_v44 }
 0x100   :  { %393 = shalt.err (!%p390_p4)
}
 0x101   :  { %s394_s17 = scalar_lea.hbm %s649_s3, 128 }
 0x102   :  { %p395_p5 = scmp.ne.s32.totalorder %s649_s3, %s394_s17  ;;  %p398_p6 = scmp.lt.u32.totalorder %s394_s17, %s649_s3 }
 0x104   :  { %p400_p7 = pnand %p398_p6, %p395_p5 }
 0x106   :  { %403 = shalt.err (!%p400_p7)
}
 0x107   :  { %241 = dma.vmem_to_hbm [thread:$0]  %s239_s15, 128, %s649_s3, [#allocation3]  }
 0x108   :  { %404 = dma.done.wait [#allocation3], 128  }
 0x109   :  { %405 = vsyncadd [#allocation3], 4294967168 }
 0x10a   :  { %245 = vsyncpa [#allocation3], 1 }

</bundles_post_ra>
